<compile_context>
chip_gen: v7x
topology: tpu7x:2x2x1
jax: 0.10.0
libtpu: 0.0.40
codegen_flags: <defaults>
</compile_context>

<pallas_src>
import functools

import jax
import jax.numpy as jnp
from jax.experimental import pallas as pl
from jax.experimental.pallas import tpu as pltpu

INPUT_DIM = 768
HIDDEN_DIM = 200
OUTPUT_DIM = 10
HIDDEN_PAD = 256   # 200 -> 256 (multiple of 128; lane-aligned intermediate)


def _round_up(n, m):
    return ((n + m - 1) // m) * m


def _mlp_kernel(x_ref, w1_ref, b1_ref, w2_ref, b2_ref, o_ref):
    # In-kernel cast: no-op on the f32 path, cheap VPU op on the bf16 path
    # (x stays f32 in HBM; weights arrive pre-cast).
    x = x_ref[...].astype(w1_ref.dtype)
    # fc1 + ReLU  (MXU matmul, f32 accumulation; bias/ReLU in f32).
    h = jnp.dot(x, w1_ref[...], preferred_element_type=jnp.float32)
    h = jnp.maximum(h + b1_ref[...], 0.0)
    # fc4 (narrow N=10 result; store to a 10-wide output block).
    y = jnp.dot(h.astype(w2_ref.dtype), w2_ref[...],
                preferred_element_type=jnp.float32)
    o_ref[...] = (y + b2_ref[...]).astype(o_ref.dtype)


def prepare_params(w1, b1, w2, b2, compute_dtype=jnp.float32):
    """One-time weight prep (pad hidden dim to 256, cast to compute dtype).

    w1: [768, 200], b1: [200], w2: [200, 10], b2: [10]  (in->out layout).
    Padding is with zeros, so the padded hidden lanes are exactly 0 after
    ReLU and contribute nothing to the outputs (numerically exact).
    """
    w1p = jnp.pad(w1, ((0, 0), (0, HIDDEN_PAD - HIDDEN_DIM))).astype(compute_dtype)
    b1p = jnp.pad(b1.reshape(1, -1),
                  ((0, 0), (0, HIDDEN_PAD - HIDDEN_DIM))).astype(jnp.float32)
    w2p = jnp.pad(w2, ((0, HIDDEN_PAD - HIDDEN_DIM), (0, 0))).astype(compute_dtype)
    b2p = b2.reshape(1, -1).astype(jnp.float32)
    return w1p, b1p, w2p, b2p


@functools.partial(jax.jit, static_argnames=("block_m",))
def mlp_forward(x, w1p, b1p, w2p, b2p, *, block_m=1024):
    """x: [B, 768] (f32); prepared params from prepare_params(). Returns [B, 10]."""
    B = x.shape[0]
    assert x.shape[1] == INPUT_DIM

    # bf16 packs 2 rows/sublane -> align tm to 16 in that case, else 8.
    mult = 16 if w1p.dtype == jnp.bfloat16 else 8
    # Aim for >=2 grid steps whenever there is enough work (v7x megacore
    # occupancy + pipelining), capped at block_m rows per step.
    tm = pl.cdiv(B, 2) if B > mult else B
    tm = _round_up(min(block_m, tm), mult)
    grid_m = pl.cdiv(B, tm)   # ragged last block handled by Pallas masking

    return pl.pallas_call(
        _mlp_kernel,
        out_shape=jax.ShapeDtypeStruct((B, OUTPUT_DIM), x.dtype),
        grid=(grid_m,),
        in_specs=[
            pl.BlockSpec((tm, INPUT_DIM), lambda i: (i, 0)),           # streamed
            pl.BlockSpec((INPUT_DIM, HIDDEN_PAD), lambda i: (0, 0)),   # resident
            pl.BlockSpec((1, HIDDEN_PAD), lambda i: (0, 0)),           # resident
            pl.BlockSpec((HIDDEN_PAD, OUTPUT_DIM), lambda i: (0, 0)),  # resident
            pl.BlockSpec((1, OUTPUT_DIM), lambda i: (0, 0)),           # resident
        ],
        out_specs=pl.BlockSpec((tm, OUTPUT_DIM), lambda i: (i, 0)),
        compiler_params=pltpu.CompilerParams(
            # Independent batch tiles -> shard across TensorCores on v7x.
            dimension_semantics=("parallel",),
        ),
    )(x, w1p, b1p, w2p, b2p)


def init_params(key):
    """Deterministic init mimicking nn.Linear's U(-1/sqrt(fan_in), 1/sqrt(fan_in))."""
    k1, k2, k3, k4 = jax.random.split(key, 4)
    bound1 = 1.0 / jnp.sqrt(INPUT_DIM)
    bound2 = 1.0 / jnp.sqrt(HIDDEN_DIM)
    # Stored as [in_features, out_features] (transpose of PyTorch's layout).
    w1 = jax.random.uniform(k1, (INPUT_DIM, HIDDEN_DIM), jnp.float32, -bound1, bound1)
    b1 = jax.random.uniform(k2, (HIDDEN_DIM,), jnp.float32, -bound1, bound1)
    w2 = jax.random.uniform(k3, (HIDDEN_DIM, OUTPUT_DIM), jnp.float32, -bound2, bound2)
    b2 = jax.random.uniform(k4, (OUTPUT_DIM,), jnp.float32, -bound2, bound2)
    return w1, b1, w2, b2


if __name__ == "__main__":
    key = jax.random.PRNGKey(0)
    kx, kp = jax.random.split(key)

    w1, b1, w2, b2 = init_params(kp)

    # One-time weight prep: exact f32 path and fast bf16 MXU path.
    p_f32 = prepare_params(w1, b1, w2, b2, jnp.float32)
    p_bf16 = prepare_params(w1, b1, w2, b2, jnp.bfloat16)

    # Small batch (single grid step), f32 path -> matches PyTorch numerics.
    batch = 8
    x = jax.random.normal(kx, (batch, INPUT_DIM), jnp.float32)
    ref = jnp.maximum(x @ w1 + b1, 0.0) @ w2 + b2

    out = jax.block_until_ready(mlp_forward(x, *p_f32))
    assert out.shape == (batch, OUTPUT_DIM)
    assert jnp.allclose(out, ref, atol=1e-4, rtol=1e-4)

    # bf16 MXU path (in-kernel cast, f32 accumulation) -> looser tolerance.
    out_bf16 = jax.block_until_ready(mlp_forward(x, *p_bf16))
    assert out_bf16.shape == (batch, OUTPUT_DIM)
    assert jnp.allclose(out_bf16, ref, atol=1e-1, rtol=5e-2)

    # Larger batch: 2 grid steps with a ragged last block (no wrapper padding).
    xb = jax.random.normal(kx, (1000, INPUT_DIM), jnp.float32)
    ref_big = jnp.maximum(xb @ w1 + b1, 0.0) @ w2 + b2
    out_big = jax.block_until_ready(mlp_forward(xb, *p_f32, block_m=512))
    assert out_big.shape == (1000, OUTPUT_DIM)
    assert jnp.allclose(out_big, ref_big, atol=1e-4, rtol=1e-4)

    print("KERNEL_OK")
</pallas_src>

<mosaic_0001>
module attributes {stable_mosaic.version = 11 : i64} {
  func.func @_mlp_kernel(%arg0: i32, %arg1: memref<8x768xf32, #tpu.memory_space<vmem>>, %arg2: memref<768x256xf32, #tpu.memory_space<vmem>>, %arg3: memref<1x256xf32, #tpu.memory_space<vmem>>, %arg4: memref<256x10xf32, #tpu.memory_space<vmem>>, %arg5: memref<1x10xf32, #tpu.memory_space<vmem>>, %arg6: memref<8x10xf32, #tpu.memory_space<vmem>>) attributes {dimension_semantics = [#tpu.dimension_semantics<parallel>], iteration_bounds = array<i64: 1>, scalar_prefetch = 0 : i64, scratch_operands = 0 : i64, tpu.core_type = #tpu.core_type<tc>, window_params = [{transform_indices = @transform_0, window_bounds = array<i64: 8, 768>}, {pipeline_mode = #tpu.pipeline_mode<synchronous>, transform_indices = @transform_1, window_bounds = array<i64: 768, 256>}, {pipeline_mode = #tpu.pipeline_mode<synchronous>, transform_indices = @transform_2, window_bounds = array<i64: 1, 256>}, {pipeline_mode = #tpu.pipeline_mode<synchronous>, transform_indices = @transform_3, window_bounds = array<i64: 256, 10>}, {pipeline_mode = #tpu.pipeline_mode<synchronous>, transform_indices = @transform_4, window_bounds = array<i64: 1, 10>}, {transform_indices = @transform_5, window_bounds = array<i64: 8, 10>}]} {
    %c0 = arith.constant 0 : index
    %c0_0 = arith.constant 0 : index
    %0 = vector.load %arg1[%c0, %c0_0] : memref<8x768xf32, #tpu.memory_space<vmem>>, vector<8x768xf32>
    %c0_1 = arith.constant 0 : index
    %c0_2 = arith.constant 0 : index
    %1 = vector.load %arg2[%c0_1, %c0_2] : memref<768x256xf32, #tpu.memory_space<vmem>>, vector<768x256xf32>
    %cst = arith.constant dense<0.000000e+00> : vector<8x256xf32>
    %2 = tpu.matmul %0, %1, %cst {dimension_numbers = #tpu.dot_dimension_numbers<[1], [0], [0], [1], [0, 0, 1, 1], [], []>} : vector<8x768xf32>, vector<768x256xf32>, vector<8x256xf32> -> vector<8x256xf32>
    %c0_3 = arith.constant 0 : index
    %c0_4 = arith.constant 0 : index
    %3 = vector.load %arg3[%c0_3, %c0_4] : memref<1x256xf32, #tpu.memory_space<vmem>>, vector<1x256xf32>
    %4 = vector.broadcast %3 : vector<1x256xf32> to vector<8x256xf32>
    %5 = arith.addf %2, %4 : vector<8x256xf32>
    %cst_5 = arith.constant 0.000000e+00 : f32
    %6 = vector.broadcast %cst_5 : f32 to vector<8x256xf32>
    %7 = arith.maximumf %5, %6 : vector<8x256xf32>
    %c0_6 = arith.constant 0 : index
    %c0_7 = arith.constant 0 : index
    %8 = vector.load %arg4[%c0_6, %c0_7] : memref<256x10xf32, #tpu.memory_space<vmem>>, vector<256x10xf32>
    %cst_8 = arith.constant dense<0.000000e+00> : vector<8x10xf32>
    %9 = tpu.matmul %7, %8, %cst_8 {dimension_numbers = #tpu.dot_dimension_numbers<[1], [0], [0], [1], [0, 0, 1, 1], [], []>} : vector<8x256xf32>, vector<256x10xf32>, vector<8x10xf32> -> vector<8x10xf32>
    %c0_9 = arith.constant 0 : index
    %c0_10 = arith.constant 0 : index
    %10 = vector.load %arg5[%c0_9, %c0_10] : memref<1x10xf32, #tpu.memory_space<vmem>>, vector<1x10xf32>
    %11 = vector.broadcast %10 : vector<1x10xf32> to vector<8x10xf32>
    %12 = arith.addf %9, %11 : vector<8x10xf32>
    %c0_11 = arith.constant 0 : index
    %c0_12 = arith.constant 0 : index
    %13 = vector.load %arg6[%c0_11, %c0_12] : memref<8x10xf32, #tpu.memory_space<vmem>>, vector<8x10xf32>
    tpu.vector_store %arg6[%c0_11, %c0_12], %12 {strides = array<i32>} : memref<8x10xf32, #tpu.memory_space<vmem>>, vector<8x10xf32>,
    return
  }
  func.func @transform_0(%arg0: i32) -> (i32, i32) {
    %c0_i32 = arith.constant 0 : i32
    %c0_i32_0 = arith.constant 0 : i32
    return %arg0, %c0_i32 : i32, i32
  }
  func.func @transform_1(%arg0: i32) -> (i32, i32) {
    %c0_i32 = arith.constant 0 : i32
    %c0_i32_0 = arith.constant 0 : i32
    %c0_i32_1 = arith.constant 0 : i32
    return %c0_i32, %c0_i32_0 : i32, i32
  }
  func.func @transform_2(%arg0: i32) -> (i32, i32) {
    %c0_i32 = arith.constant 0 : i32
    %c0_i32_0 = arith.constant 0 : i32
    %c0_i32_1 = arith.constant 0 : i32
    return %c0_i32, %c0_i32_0 : i32, i32
  }
  func.func @transform_3(%arg0: i32) -> (i32, i32) {
    %c0_i32 = arith.constant 0 : i32
    %c0_i32_0 = arith.constant 0 : i32
    %c0_i32_1 = arith.constant 0 : i32
    return %c0_i32, %c0_i32_0 : i32, i32
  }
  func.func @transform_4(%arg0: i32) -> (i32, i32) {
    %c0_i32 = arith.constant 0 : i32
    %c0_i32_0 = arith.constant 0 : i32
    %c0_i32_1 = arith.constant 0 : i32
    return %c0_i32, %c0_i32_0 : i32, i32
  }
  func.func @transform_5(%arg0: i32) -> (i32, i32) {
    %c0_i32 = arith.constant 0 : i32
    %c0_i32_0 = arith.constant 0 : i32
    return %arg0, %c0_i32 : i32, i32
  }
}

</mosaic_0001>

<bundles_post_ra>
// kernel: mlp_forward.1
= control target key start
LH: loop header
LB: loop body
LE: loop exit
PB: predicated region body
PF: predicated region fallthrough
CT: control target
= control target key end

     0   :  { %10 = vsyncpa [#allocation3], 0  ;;  %s1082_s0 = inlined_call_operand.vmem [shape: f32[8,768], index: 0, kind: input, shape index: {}]   ;;  %s1083_s1 = inlined_call_operand.hbm [shape: f32[768,256], index: 1, kind: input, shape index: {}]   ;;  %s1084_s2 = inlined_call_operand.vmem [shape: f32[1,256], index: 2, kind: input, shape index: {}]   ;;  %s1085_s3 = inlined_call_operand.vmem [shape: f32[256,10], index: 3, kind: input, shape index: {}]   ;;  %s1086_s4 = inlined_call_operand.vmem [shape: f32[1,10], index: 4, kind: input, shape index: {}]   ;;  %s1087_s5 = inlined_call_operand.hbm [shape: f32[8,10], index: 5, kind: output, shape index: {}]  }
   0x1   :  { %11 = vsyncpa [#allocation4], 0  ;;  %s904_s18 = smov [#allocation2]   ;;  %s856_s22 = scalar_lea.hbm %s1083_s1, 24576 }
   0x2   :  { %s19_s19 = sshll.u32 %s904_s18, 4  ;;  %p857_p0 = scmp.ne.s32.totalorder %s1083_s1, %s856_s22  ;;  %s20_s19 = int_to_ptr.vmem [resolvable:$true] %s19_s19 }
   0x3   :  { %p860_p1 = scmp.lt.u32.totalorder %s856_s22, %s1083_s1 }
   0x5   :  { %p862_p2 = pnand %p860_p1, %p857_p0 }
   0x7   :  { %865 = shalt.err (!%p862_p2)
}
   0x8   :  { %s866_s27 = scalar_lea.vmem %s20_s19, 24576  ;;  %p871_p4 = scmp.lt.s32.totalorder %s20_s19, %s20_s19 }
   0x9   :  { %p867_p3 = scmp.ne.s32.totalorder %s20_s19, %s866_s27  ;;  %p872_p5 = scmp.lt.s32.totalorder %s866_s27, %s866_s27 }
   0xb   :  { %p873_p6 = por %p872_p5, %p871_p4 }
   0xd   :  { %p874_p7 = pnand %p873_p6, %p867_p3 }
   0xf   :  { %877 = shalt.err (!%p874_p7)
}
  0x10   :  { %s905_s28 = smov 256   ;;  %s906_s29 = smov 16  }
  0x11   :  { %25 = dma.hbm_to_vmem [thread:$0]  %s1083_s1, 24576, %s20_s19, [#allocation3], %s905_s28, %s905_s28, %s906_s29  }
  0x12   :  { %900 = dma.done.wait [#allocation3], 24576  }
  0x13   :  { %901 = vsyncadd [#allocation3], 4294942720  ;;  %v106_v0 = vld [vmem:[#allocation2 + $0x208] sm:$0xff]  ;;  %v108_v1 = vld [vmem:[#allocation2 + $0x218] sm:$0xff]  ;;  %vm569_vm0 = vcmask 80896  }
  0x14   :  { %v105_v2 = vld [vmem:[#allocation2 + $0x200] sm:$0xff]  ;;  %v686_v3 = vpack.c.bf16 %v108_v1, %v106_v0  ;;  %v107_v4 = vld [vmem:[#allocation2 + $0x210] sm:$0xff]  ;;  %v110_v5 = vld [vmem:[#allocation2 + $0x228] sm:$0xff] }
  0x15   :  { %v112_v6 = vld [vmem:[#allocation2 + $0x238] sm:$0xff]  ;;  %v688_v7 = vpack.c.bf16 %v107_v4, %v105_v2  ;;  %v109_v9 = vld [vmem:[#allocation2 + $0x220] sm:$0xff]  ;;  %v111_v10 = vld [vmem:[#allocation2 + $0x230] sm:$0xff] }
  0x16   :  { %v690_v8 = vpack.c.bf16 %v112_v6, %v110_v5  ;;  %v114_v11 = vld [vmem:[#allocation2 + $0x248] sm:$0xff]  ;;  %687 = vmatprep.subr.bf16.mxu0 %v686_v3  ;;  %v116_v12 = vld [vmem:[#allocation2 + $0x258] sm:$0xff]  ;;  %v692_v13 = vpack.c.bf16 %v111_v10, %v109_v9  ;;  %v113_v15 = vld [vmem:[#allocation2 + $0x240] sm:$0xff] }
  0x17   :  { %689 = vmatpush1.bf16.msra.mxu0 %v688_v7  ;;  %v694_v14 = vpack.c.bf16 %v116_v12, %v114_v11  ;;  %v115_v16 = vld [vmem:[#allocation2 + $0x250] sm:$0xff]  ;;  %v118_v17 = vld [vmem:[#allocation2 + $0x268] sm:$0xff]  ;;  %v120_v18 = vld [vmem:[#allocation2 + $0x278] sm:$0xff] }
  0x18   :  { %691 = vmatprep.subr.bf16.mxu0 %v690_v8  ;;  %v696_v19 = vpack.c.bf16 %v115_v16, %v113_v15  ;;  %v698_v20 = vpack.c.bf16 %v120_v18, %v118_v17  ;;  %v117_v21 = vld [vmem:[#allocation2 + $0x260] sm:$0xff]  ;;  %v119_v22 = vld [vmem:[#allocation2 + $0x270] sm:$0xff]  ;;  %v122_v23 = vld [vmem:[#allocation2 + $0x288] sm:$0xff] }
  0x19   :  { %v124_v24 = vld [vmem:[#allocation2 + $0x298] sm:$0xff]  ;;  %v700_v25 = vpack.c.bf16 %v119_v22, %v117_v21  ;;  %v121_v27 = vld [vmem:[#allocation2 + $0x280] sm:$0xff]  ;;  %v123_v28 = vld [vmem:[#allocation2 + $0x290] sm:$0xff] }
  0x1a   :  { %v702_v26 = vpack.c.bf16 %v124_v24, %v122_v23  ;;  %v126_v29 = vld [vmem:[#allocation2 + $0x2a8] sm:$0xff]  ;;  %v128_v30 = vld [vmem:[#allocation2 + $0x2b8] sm:$0xff]  ;;  %v704_v31 = vpack.c.bf16 %v123_v28, %v121_v27  ;;  %v125_v33 = vld [vmem:[#allocation2 + $0x2a0] sm:$0xff] }
  0x1b   :  { %693 = vmatpush1.bf16.msra.mxu0 %v692_v13  ;;  %v706_v32 = vpack.c.bf16 %v128_v30, %v126_v29  ;;  %v127_v34 = vld [vmem:[#allocation2 + $0x2b0] sm:$0xff]  ;;  %v130_v35 = vld [vmem:[#allocation2 + $0x2c8] sm:$0xff]  ;;  %v132_v36 = vld [vmem:[#allocation2 + $0x2d8] sm:$0xff] }
  0x1c   :  { %695 = vmatprep.subr.bf16.mxu0 %v694_v14  ;;  %v708_v37 = vpack.c.bf16 %v127_v34, %v125_v33  ;;  %v129_v38 = vld [vmem:[#allocation2 + $0x2c0] sm:$0xff]  ;;  %v131_v39 = vld [vmem:[#allocation2 + $0x2d0] sm:$0xff]  ;;  %v42_v40 = vld [vmem:[#allocation2 + $0x8] sm:$0xff]  ;;  %v710_v41 = vpack.c.bf16 %v132_v36, %v130_v35 }
  0x1d   :  { %v134_v42 = vld [vmem:[#allocation2 + $0x2e8] sm:$0xff]  ;;  %v136_v43 = vld [vmem:[#allocation2 + $0x2f8] sm:$0xff]  ;;  %v41_v46 = vld [vmem:[#allocation2] sm:$0xff]  ;;  %v712_v51 = vpack.c.bf16 %v131_v39, %v129_v38 }
  0x1e   :  { %v44_v44 = vld [vmem:[#allocation2 + $0x18] sm:$0xff]  ;;  %v43_v47 = vld [vmem:[#allocation2 + $0x10] sm:$0xff]  ;;  %v46_v50 = vld [vmem:[#allocation2 + $0x28] sm:$0xff]  ;;  %v714_v54 = vpack.c.bf16 %v136_v43, %v134_v42 }
  0x1f   :  { %697 = vmatpush1.bf16.msra.mxu0 %v696_v19  ;;  %v622_v45 = vpack.c.bf16 %v44_v44, %v42_v40  ;;  %v38_v48 = vld [vmem:[%s1082_s0 + $0x18] sm:$0xff]  ;;  %v624_v49 = vpack.c.bf16 %v43_v47, %v41_v46  ;;  %v133_v52 = vld [vmem:[#allocation2 + $0x2e0] sm:$0xff]  ;;  %v135_v55 = vld [vmem:[#allocation2 + $0x2f0] sm:$0xff] }
  0x20   :  { %699 = vmatprep.subr.bf16.mxu0 %v698_v20  ;;  %380 = vmatprep.mubr.f32.mxu0 %v38_v48  ;;  %v48_v53 = vld [vmem:[#allocation2 + $0x38] sm:$0xff]  ;;  %v45_v57 = vld [vmem:[#allocation2 + $0x20] sm:$0xff]  ;;  %v47_v58 = vld [vmem:[#allocation2 + $0x30] sm:$0xff]  ;;  %v716_v0 = vpack.c.bf16 %v135_v55, %v133_v52 }
  0x21   :  { %623 = vmatprep.subr.bf16.mxu1 %v622_v45  ;;  %v626_v56 = vpack.c.bf16 %v48_v53, %v46_v50  ;;  %v138_v59 = vld [vmem:[#allocation2 + $0x308] sm:$0xff]  ;;  %v140_v60 = vld [vmem:[#allocation2 + $0x318] sm:$0xff]  ;;  %v628_v61 = vpack.c.bf16 %v47_v58, %v45_v57  ;;  %v137_v1 = vld [vmem:[#allocation2 + $0x300] sm:$0xff] }
  0x22   :  { %625 = vmatpush1.bf16.msra.mxu1 %v624_v49  ;;  %v50_v62 = vld [vmem:[#allocation2 + $0x48] sm:$0xff]  ;;  %v52_v63 = vld [vmem:[#allocation2 + $0x58] sm:$0xff]  ;;  %v49_v3 = vld [vmem:[#allocation2 + $0x40] sm:$0xff]  ;;  %v718_v5 = vpack.c.bf16 %v140_v60, %v138_v59 }
  0x23   :  { %701 = vmatpush1.bf16.msra.mxu0 %v700_v25  ;;  %627 = vmatprep.subr.bf16.mxu1 %v626_v56  ;;  %v630_v2 = vpack.c.bf16 %v52_v63, %v50_v62  ;;  %v51_v4 = vld [vmem:[#allocation2 + $0x50] sm:$0xff]  ;;  %v54_v8 = vld [vmem:[#allocation2 + $0x68] sm:$0xff]  ;;  %v56_v9 = vld [vmem:[#allocation2 + $0x78] sm:$0xff] }
  0x24   :  { %703 = vmatprep.subr.bf16.mxu0 %v702_v26  ;;  %v139_v6 = vld [vmem:[#allocation2 + $0x310] sm:$0xff]  ;;  %v632_v7 = vpack.c.bf16 %v51_v4, %v49_v3  ;;  %v142_v10 = vld [vmem:[#allocation2 + $0x328] sm:$0xff]  ;;  %v144_v11 = vld [vmem:[#allocation2 + $0x338] sm:$0xff]  ;;  %v634_v12 = vpack.c.bf16 %v56_v9, %v54_v8 }
  0x25   :  { %v53_v13 = vld [vmem:[#allocation2 + $0x60] sm:$0xff]  ;;  %v55_v14 = vld [vmem:[#allocation2 + $0x70] sm:$0xff]  ;;  %v720_v15 = vpack.c.bf16 %v139_v6, %v137_v1  ;;  %v58_v16 = vld [vmem:[#allocation2 + $0x88] sm:$0xff]  ;;  %v722_v18 = vpack.c.bf16 %v144_v11, %v142_v10 }
  0x26   :  { %629 = vmatpush1.bf16.msra.mxu1 %v628_v61  ;;  %v60_v17 = vld [vmem:[#allocation2 + $0x98] sm:$0xff]  ;;  %v141_v19 = vld [vmem:[#allocation2 + $0x320] sm:$0xff]  ;;  %v143_v20 = vld [vmem:[#allocation2 + $0x330] sm:$0xff]  ;;  %v636_v22 = vpack.c.bf16 %v55_v14, %v53_v13 }
  0x27   :  { %705 = vmatpush1.bf16.msra.mxu0 %v704_v31  ;;  %631 = vmatprep.subr.bf16.mxu1 %v630_v2  ;;  %v146_v21 = vld [vmem:[#allocation2 + $0x348] sm:$0xff]  ;;  %v148_v23 = vld [vmem:[#allocation2 + $0x358] sm:$0xff]  ;;  %v638_v24 = vpack.c.bf16 %v60_v17, %v58_v16  ;;  %v57_v25 = vld [vmem:[#allocation2 + $0x80] sm:$0xff]  ;;  %v724_v29 = vpack.c.bf16 %v143_v20, %v141_v19 }
  0x28   :  { %707 = vmatprep.subr.bf16.mxu0 %v706_v32  ;;  %v59_v26 = vld [vmem:[#allocation2 + $0x90] sm:$0xff]  ;;  %v62_v27 = vld [vmem:[#allocation2 + $0xa8] sm:$0xff]  ;;  %v64_v28 = vld [vmem:[#allocation2 + $0xb8] sm:$0xff]  ;;  %v726_v30 = vpack.c.bf16 %v148_v23, %v146_v21 }
  0x29   :  { %v145_v31 = vld [vmem:[#allocation2 + $0x340] sm:$0xff]  ;;  %v147_v32 = vld [vmem:[#allocation2 + $0x350] sm:$0xff]  ;;  %v150_v33 = vld [vmem:[#allocation2 + $0x368] sm:$0xff]  ;;  %v640_v34 = vpack.c.bf16 %v59_v26, %v57_v25  ;;  %v642_v36 = vpack.c.bf16 %v64_v28, %v62_v27 }
  0x2a   :  { %633 = vmatpush1.bf16.msra.mxu1 %v632_v7  ;;  %v152_v35 = vld [vmem:[#allocation2 + $0x378] sm:$0xff]  ;;  %v63_v38 = vld [vmem:[#allocation2 + $0xb0] sm:$0xff]  ;;  %v66_v39 = vld [vmem:[#allocation2 + $0xc8] sm:$0xff] }
  0x2b   :  { %709 = vmatpush1.bf16.msra.mxu0 %v708_v37  ;;  %635 = vmatprep.subr.bf16.mxu1 %v634_v12  ;;  %v61_v37 = vld [vmem:[#allocation2 + $0xa0] sm:$0xff]  ;;  %v68_v40 = vld [vmem:[#allocation2 + $0xd8] sm:$0xff]  ;;  %v730_v42 = vpack.c.bf16 %v152_v35, %v150_v33  ;;  %v151_v44 = vld [vmem:[#allocation2 + $0x370] sm:$0xff] }
  0x2c   :  { %711 = vmatprep.subr.bf16.mxu0 %v710_v41  ;;  %v728_v41 = vpack.c.bf16 %v147_v32, %v145_v31  ;;  %v149_v43 = vld [vmem:[#allocation2 + $0x360] sm:$0xff]  ;;  %v154_v45 = vld [vmem:[#allocation2 + $0x388] sm:$0xff]  ;;  %v644_v46 = vpack.c.bf16 %v63_v38, %v61_v37  ;;  %v156_v47 = vld [vmem:[#allocation2 + $0x398] sm:$0xff]  ;;  %v646_v48 = vpack.c.bf16 %v68_v40, %v66_v39 }
  0x2d   :  { %v65_v49 = vld [vmem:[#allocation2 + $0xc0] sm:$0xff]  ;;  %v67_v50 = vld [vmem:[#allocation2 + $0xd0] sm:$0xff]  ;;  %v72_v52 = vld [vmem:[#allocation2 + $0xf8] sm:$0xff]  ;;  %v732_v53 = vpack.c.bf16 %v151_v44, %v149_v43 }
  0x2e   :  { %637 = vmatpush1.bf16.msra.mxu1 %v636_v22  ;;  %v153_v55 = vld [vmem:[#allocation2 + $0x380] sm:$0xff]  ;;  %v155_v56 = vld [vmem:[#allocation2 + $0x390] sm:$0xff]  ;;  %v158_v57 = vld [vmem:[#allocation2 + $0x3a8] sm:$0xff]  ;;  %v648_v58 = vpack.c.bf16 %v67_v50, %v65_v49 }
  0x2f   :  { %713 = vmatpush1.bf16.msra.mxu0 %v712_v51  ;;  %639 = vmatprep.subr.bf16.mxu1 %v638_v24  ;;  %v70_v51 = vld [vmem:[#allocation2 + $0xe8] sm:$0xff]  ;;  %v160_v59 = vld [vmem:[#allocation2 + $0x3b8] sm:$0xff]  ;;  %v69_v61 = vld [vmem:[#allocation2 + $0xe0] sm:$0xff]  ;;  %v736_v1 = vpack.c.bf16 %v155_v56, %v153_v55 }
  0x30   :  { %715 = vmatprep.subr.bf16.mxu0 %v714_v54  ;;  %v734_v54 = vpack.c.bf16 %v156_v47, %v154_v45  ;;  %v650_v60 = vpack.c.bf16 %v72_v52, %v70_v51  ;;  %v71_v62 = vld [vmem:[#allocation2 + $0xf0] sm:$0xff]  ;;  %v74_v63 = vld [vmem:[#allocation2 + $0x108] sm:$0xff]  ;;  %v738_v2 = vpack.c.bf16 %v160_v59, %v158_v57  ;;  %v157_v3 = vld [vmem:[#allocation2 + $0x3a0] sm:$0xff] }
  0x31   :  { %v159_v4 = vld [vmem:[#allocation2 + $0x3b0] sm:$0xff]  ;;  %v652_v6 = vpack.c.bf16 %v71_v62, %v69_v61  ;;  %v164_v7 = vld [vmem:[#allocation2 + $0x3d8] sm:$0xff]  ;;  %v73_v9 = vld [vmem:[#allocation2 + $0x100] sm:$0xff] }
  0x32   :  { %641 = vmatpush1.bf16.msra.mxu1 %v640_v34  ;;  %v75_v10 = vld [vmem:[#allocation2 + $0x110] sm:$0xff]  ;;  %v78_v11 = vld [vmem:[#allocation2 + $0x128] sm:$0xff]  ;;  %v80_v12 = vld [vmem:[#allocation2 + $0x138] sm:$0xff]  ;;  %v740_v13 = vpack.c.bf16 %v159_v4, %v157_v3 }
  0x33   :  { %717 = vmatpush1.bf16.msra.mxu0 %v716_v0  ;;  %643 = vmatprep.subr.bf16.mxu1 %v642_v36  ;;  %v76_v0 = vld [vmem:[#allocation2 + $0x118] sm:$0xff]  ;;  %v163_v16 = vld [vmem:[#allocation2 + $0x3d0] sm:$0xff]  ;;  %v166_v17 = vld [vmem:[#allocation2 + $0x3e8] sm:$0xff]  ;;  %v658_v20 = vpack.c.bf16 %v80_v12, %v78_v11 }
  0x34   :  { %719 = vmatprep.subr.bf16.mxu0 %v718_v5  ;;  %v162_v5 = vld [vmem:[#allocation2 + $0x3c8] sm:$0xff]  ;;  %v654_v8 = vpack.c.bf16 %v76_v0, %v74_v63  ;;  %v168_v19 = vld [vmem:[#allocation2 + $0x3f8] sm:$0xff]  ;;  %v77_v21 = vld [vmem:[#allocation2 + $0x120] sm:$0xff] }
  0x35   :  { %v742_v14 = vpack.c.bf16 %v164_v7, %v162_v5  ;;  %v79_v22 = vld [vmem:[#allocation2 + $0x130] sm:$0xff]  ;;  %v82_v23 = vld [vmem:[#allocation2 + $0x148] sm:$0xff]  ;;  %v84_v24 = vld [vmem:[#allocation2 + $0x158] sm:$0xff]  ;;  %v746_v26 = vpack.c.bf16 %v168_v19, %v166_v17 }
  0x36   :  { %645 = vmatpush1.bf16.msra.mxu1 %v644_v46  ;;  %v165_v27 = vld [vmem:[#allocation2 + $0x3e0] sm:$0xff]  ;;  %v167_v28 = vld [vmem:[#allocation2 + $0x3f0] sm:$0xff]  ;;  %v172_v31 = vld [vmem:[#allocation2 + $0x418] sm:$0xff]  ;;  %v662_v32 = vpack.c.bf16 %v84_v24, %v82_v23 }
  0x37   :  { %721 = vmatpush1.bf16.msra.mxu0 %v720_v15  ;;  %647 = vmatprep.subr.bf16.mxu1 %v646_v48  ;;  %v161_v15 = vld [vmem:[#allocation2 + $0x3c0] sm:$0xff]  ;;  %v83_v34 = vld [vmem:[#allocation2 + $0x150] sm:$0xff]  ;;  %v86_v35 = vld [vmem:[#allocation2 + $0x168] sm:$0xff]  ;;  %v748_v37 = vpack.c.bf16 %v167_v28, %v165_v27 }
  0x38   :  { %723 = vmatprep.subr.bf16.mxu0 %v722_v18  ;;  %v656_v18 = vpack.c.bf16 %v75_v10, %v73_v9  ;;  %v744_v25 = vpack.c.bf16 %v163_v16, %v161_v15  ;;  %v81_v33 = vld [vmem:[#allocation2 + $0x140] sm:$0xff]  ;;  %v88_v36 = vld [vmem:[#allocation2 + $0x178] sm:$0xff]  ;;  %v171_v40 = vld [vmem:[#allocation2 + $0x410] sm:$0xff] }
  0x39   :  { %v169_v39 = vld [vmem:[#allocation2 + $0x400] sm:$0xff]  ;;  %v176_v43 = vld [vmem:[#allocation2 + $0x438] sm:$0xff]  ;;  %v666_v44 = vpack.c.bf16 %v88_v36, %v86_v35  ;;  %v87_v46 = vld [vmem:[#allocation2 + $0x170] sm:$0xff] }
  0x3a   :  { %649 = vmatpush1.bf16.msra.mxu1 %v648_v58  ;;  %v85_v45 = vld [vmem:[#allocation2 + $0x160] sm:$0xff]  ;;  %v90_v47 = vld [vmem:[#allocation2 + $0x188] sm:$0xff]  ;;  %v92_v48 = vld [vmem:[#allocation2 + $0x198] sm:$0xff]  ;;  %v752_v51 = vpack.c.bf16 %v171_v40, %v169_v39 }
  0x3b   :  { %725 = vmatpush1.bf16.msra.mxu0 %v724_v29  ;;  %651 = vmatprep.subr.bf16.mxu1 %v650_v60  ;;  %v170_v29 = vld [vmem:[#allocation2 + $0x408] sm:$0xff]  ;;  %v37_v50 = vld [vmem:[%s1082_s0 + $0x10] sm:$0xff]  ;;  %v173_v52 = vld [vmem:[#allocation2 + $0x420] sm:$0xff]  ;;  %v668_v56 = vpack.c.bf16 %v87_v46, %v85_v45  ;;  %v670_v59 = vpack.c.bf16 %v92_v48, %v90_v47 }
  0x3c   :  { %727 = vmatprep.subr.bf16.mxu0 %v726_v30  ;;  %v660_v30 = vpack.c.bf16 %v79_v22, %v77_v21  ;;  %v750_v38 = vpack.c.bf16 %v172_v31, %v170_v29  ;;  %v36_v49 = vld [vmem:[%s1082_s0 + $0x8] sm:$0xff]  ;;  %v180_v58 = vld [vmem:[#allocation2 + $0x458] sm:$0xff]  ;;  %v89_v60 = vld [vmem:[#allocation2 + $0x180] sm:$0xff] }
  0x3d   :  { %309 = vmatprep.mubr.f32.mxu1 %v36_v49  ;;  %v178_v55 = vld [vmem:[#allocation2 + $0x448] sm:$0xff]  ;;  %v91_v61 = vld [vmem:[#allocation2 + $0x190] sm:$0xff]  ;;  %v96_v63 = vld [vmem:[#allocation2 + $0x1b8] sm:$0xff] }
  0x3e   :  { %653 = vmatpush1.bf16.msra.mxu1 %v652_v6  ;;  %v40_v57 = vld [vmem:[%s1082_s0 + $0x28] sm:$0xff]  ;;  %v179_v3 = vld [vmem:[#allocation2 + $0x450] sm:$0xff]  ;;  %v672_v5 = vpack.c.bf16 %v91_v61, %v89_v60  ;;  %v184_v6 = vld [vmem:[#allocation2 + $0x478] sm:$0xff] }
  0x3f   :  { %729 = vmatpush1.bf16.msra.mxu0 %v728_v41  ;;  %655 = vmatprep.subr.bf16.mxu1 %v654_v8  ;;  %v174_v41 = vld [vmem:[#allocation2 + $0x428] sm:$0xff]  ;;  %v93_v8 = vld [vmem:[#allocation2 + $0x1a0] sm:$0xff]  ;;  %v95_v9 = vld [vmem:[#allocation2 + $0x1b0] sm:$0xff] }
  0x40   :  { %731 = vmatprep.subr.bf16.mxu0 %v730_v42  ;;  %v664_v42 = vpack.c.bf16 %v83_v34, %v81_v33  ;;  %v94_v62 = vld [vmem:[#allocation2 + $0x1a8] sm:$0xff]  ;;  %v100_v11 = vld [vmem:[#allocation2 + $0x1d8] sm:$0xff]  ;;  %v183_v15 = vld [vmem:[#allocation2 + $0x470] sm:$0xff]  ;;  %v676_v17 = vpack.c.bf16 %v95_v9, %v93_v8 }
  0x41   :  { %v182_v4 = vld [vmem:[#allocation2 + $0x468] sm:$0xff]  ;;  %v674_v7 = vpack.c.bf16 %v96_v63, %v94_v62  ;;  %v99_v21 = vld [vmem:[#allocation2 + $0x1d0] sm:$0xff]  ;;  %v104_v23 = vld [vmem:[#allocation2 + $0x1f8] sm:$0xff] }
  0x42   :  { %657 = vmatpush1.bf16.msra.mxu1 %v656_v18  ;;  %v98_v10 = vld [vmem:[#allocation2 + $0x1c8] sm:$0xff]  ;;  %v188_v18 = vld [vmem:[#allocation2 + $0x498] sm:$0xff]  ;;  %v187_v27 = vld [vmem:[#allocation2 + $0x490] sm:$0xff] }
  0x43   :  { %733 = vmatpush1.bf16.msra.mxu0 %v732_v53  ;;  %659 = vmatprep.subr.bf16.mxu1 %v658_v20  ;;  %v754_v53 = vpack.c.bf16 %v176_v43, %v174_v41  ;;  %v186_v16 = vld [vmem:[#allocation2 + $0x488] sm:$0xff]  ;;  %v678_v19 = vpack.c.bf16 %v100_v11, %v98_v10  ;;  %v97_v20 = vld [vmem:[#allocation2 + $0x1c0] sm:$0xff]  ;;  %v103_v33 = vld [vmem:[#allocation2 + $0x1f0] sm:$0xff] }
  0x44   :  { %735 = vmatprep.subr.bf16.mxu0 %v734_v54  ;;  %v175_v54 = vld [vmem:[#allocation2 + $0x430] sm:$0xff]  ;;  %v102_v22 = vld [vmem:[#allocation2 + $0x1e8] sm:$0xff]  ;;  %v680_v29 = vpack.c.bf16 %v99_v21, %v97_v20  ;;  %v476_v34 = vld [vmem:[%s1085_s3 + $0x80] sm:$0xff] }
  0x45   :  { %v756_v0 = vpack.c.bf16 %v175_v54, %v173_v52  ;;  %v190_v28 = vld [vmem:[#allocation2 + $0x4a8] sm:$0xff]  ;;  %v682_v31 = vpack.c.bf16 %v104_v23, %v102_v22  ;;  %v191_v39 = vld [vmem:[#allocation2 + $0x4b0] sm:$0xff]  ;;  %v479_v47 = vld [vmem:[%s1085_s3 + $0x98] sm:$0xff] }
  0x46   :  { %661 = vmatpush1.bf16.msra.mxu1 %v660_v30  ;;  %v192_v30 = vld [vmem:[#allocation2 + $0x4b8] sm:$0xff]  ;;  %v477_v35 = vld [vmem:[%s1085_s3 + $0x88] sm:$0xff]  ;;  %v478_v46 = vld [vmem:[%s1085_s3 + $0x90] sm:$0xff] }
  0x47   :  { %737 = vmatpush1.bf16.msra.mxu0 %v736_v1  ;;  %663 = vmatprep.subr.bf16.mxu1 %v662_v32  ;;  %v758_v1 = vpack.c.bf16 %v180_v58, %v178_v55  ;;  %v101_v32 = vld [vmem:[#allocation2 + $0x1e0] sm:$0xff]  ;;  %v194_v40 = vld [vmem:[#allocation2 + $0x4c8] sm:$0xff]  ;;  %v814_v43 = vpack.c.bf16 %v477_v35, %v476_v34  ;;  %v200_v55 = vld [vmem:[#allocation2 + $0x4f8] sm:$0xff] }
  0x48   :  { %739 = vmatprep.subr.bf16.mxu0 %v738_v2  ;;  %v177_v2 = vld [vmem:[#allocation2 + $0x440] sm:$0xff]  ;;  %v684_v41 = vpack.c.bf16 %v103_v33, %v101_v32  ;;  %v461_v45 = vld [vmem:[%s1085_s3 + $0x8] sm:$0xff]  ;;  %v463_v58 = vld [vmem:[%s1085_s3 + $0x18] sm:$0xff] }
  0x49   :  { %v760_v12 = vpack.c.bf16 %v179_v3, %v177_v2  ;;  %v193_v49 = vld [vmem:[#allocation2 + $0x4c0] sm:$0xff]  ;;  %v198_v52 = vld [vmem:[#allocation2 + $0x4e8] sm:$0xff]  ;;  %v204_v3 = vld [vmem:[#allocation2 + $0x518] sm:$0xff] }
  0x4a   :  { %665 = vmatpush1.bf16.msra.mxu1 %v664_v42  ;;  %v196_v42 = vld [vmem:[#allocation2 + $0x4d8] sm:$0xff]  ;;  %v481_v60 = vld [vmem:[%s1085_s3 + $0xa8] sm:$0xff]  ;;  %v778_v62 = vpack.c.bf16 %v200_v55, %v198_v52  ;;  %v197_v63 = vld [vmem:[#allocation2 + $0x4e0] sm:$0xff] }
  0x4b   :  { %741 = vmatpush1.bf16.msra.mxu0 %v740_v13  ;;  %667 = vmatprep.subr.bf16.mxu1 %v666_v44  ;;  %v762_v13 = vpack.c.bf16 %v184_v6, %v182_v4  ;;  %v460_v44 = vld [vmem:[%s1085_s3] sm:$0xff]  ;;  %v465_v6 = vld [vmem:[%s1085_s3 + $0x28] sm:$0xff]  ;;  %v483_v8 = vld [vmem:[%s1085_s3 + $0xb8] sm:$0xff] }
  0x4c   :  { %743 = vmatprep.subr.bf16.mxu0 %v742_v14  ;;  %v181_v14 = vld [vmem:[#allocation2 + $0x460] sm:$0xff]  ;;  %v816_v54 = vpack.c.bf16 %v461_v45, %v460_v44  ;;  %v485_v20 = vld [vmem:[%s1085_s3 + $0xc8] sm:$0xff]  ;;  %v487_v32 = vld [vmem:[%s1085_s3 + $0xd8] sm:$0xff] }
  0x4d   :  { %v764_v24 = vpack.c.bf16 %v183_v15, %v181_v14  ;;  %v201_v11 = vld [vmem:[#allocation2 + $0x500] sm:$0xff]  ;;  %v208_v15 = vld [vmem:[#allocation2 + $0x538] sm:$0xff] }
  0x4e   :  { %669 = vmatpush1.bf16.msra.mxu1 %v668_v56  ;;  %v818_v56 = vpack.c.bf16 %v479_v47, %v478_v46  ;;  %v205_v23 = vld [vmem:[#allocation2 + $0x520] sm:$0xff]  ;;  %v215_v46 = vld [vmem:[#allocation2 + $0x570] sm:$0xff]  ;;  %v224_v55 = vld [vmem:[#allocation2 + $0x5b8] sm:$0xff] }
  0x4f   :  { %745 = vmatpush1.bf16.msra.mxu0 %v744_v25  ;;  %671 = vmatprep.subr.bf16.mxu1 %v670_v59  ;;  %v766_v25 = vpack.c.bf16 %v188_v18, %v186_v16  ;;  %v480_v59 = vld [vmem:[%s1085_s3 + $0xa0] sm:$0xff]  ;;  %v467_v18 = vld [vmem:[%s1085_s3 + $0x38] sm:$0xff] }
  0x50   :  { %747 = vmatprep.subr.bf16.mxu0 %v746_v26  ;;  %v185_v26 = vld [vmem:[#allocation2 + $0x480] sm:$0xff]  ;;  %v822_v4 = vpack.c.bf16 %v481_v60, %v480_v59  ;;  %v223_v59 = vld [vmem:[#allocation2 + $0x5b0] sm:$0xff]  ;;  %v226_v60 = vld [vmem:[#allocation2 + $0x5c8] sm:$0xff] }
  0x51   :  { %v768_v36 = vpack.c.bf16 %v187_v27, %v185_v26  ;;  %v212_v27 = vld [vmem:[#allocation2 + $0x558] sm:$0xff]  ;;  %v209_v35 = vld [vmem:[#allocation2 + $0x540] sm:$0xff] }
  0x52   :  { %673 = vmatpush1.bf16.msra.mxu1 %v672_v5  ;;  %v464_v5 = vld [vmem:[%s1085_s3 + $0x20] sm:$0xff] }
  0x53   :  { %749 = vmatpush1.bf16.msra.mxu0 %v748_v37  ;;  %675 = vmatprep.subr.bf16.mxu1 %v674_v7  ;;  %v770_v37 = vpack.c.bf16 %v192_v30, %v190_v28  ;;  %v482_v7 = vld [vmem:[%s1085_s3 + $0xb0] sm:$0xff]  ;;  %v824_v14 = vpack.c.bf16 %v465_v6, %v464_v5  ;;  %v469_v30 = vld [vmem:[%s1085_s3 + $0x48] sm:$0xff]  ;;  %v213_v45 = vld [vmem:[#allocation2 + $0x560] sm:$0xff] }
  0x54   :  { %751 = vmatprep.subr.bf16.mxu0 %v750_v38  ;;  %v189_v38 = vld [vmem:[#allocation2 + $0x4a0] sm:$0xff]  ;;  %v826_v16 = vpack.c.bf16 %v483_v8, %v482_v7  ;;  %v231_v7 = vld [vmem:[#allocation2 + $0x5f0] sm:$0xff] }
  0x55   :  { %v772_v48 = vpack.c.bf16 %v191_v39, %v189_v38  ;;  %v216_v39 = vld [vmem:[#allocation2 + $0x578] sm:$0xff]  ;;  %v217_v52 = vld [vmem:[#allocation2 + $0x580] sm:$0xff] }
  0x56   :  { %381 = vmatmul.mubr.f32.vlgmr.msra.gmra.mrb[0].mxu0 %v37_v50  ;;  %677 = vmatpush1.bf16.msra.mxu1 %v676_v17  ;;  %v774_v50 = vpack.c.bf16 %v196_v42, %v194_v40  ;;  %v466_v17 = vld [vmem:[%s1085_s3 + $0x30] sm:$0xff]  ;;  %v471_v42 = vld [vmem:[%s1085_s3 + $0x58] sm:$0xff]  ;;  %v229_v6 = vld [vmem:[#allocation2 + $0x5e0] sm:$0xff] }
  0x57   :  { %753 = vmatpush1.bf16.msra.mxu0 %v752_v51  ;;  %451 = vmatprep.mubr.f32.mxu0 %v40_v57  ;;  %v195_v51 = vld [vmem:[#allocation2 + $0x4d0] sm:$0xff]  ;;  %v828_v26 = vpack.c.bf16 %v467_v18, %v466_v17  ;;  %v812_v8 = vpack.c.bf16 %v231_v7, %v229_v6  ;;  %v491_v17 = vld [vmem:[%s1085_s3 + $0xf8] sm:$0xff] }
  0x58   :  { %755 = vmatprep.subr.bf16.mxu0 %v754_v53  ;;  %679 = vmatprep.subr.bf16.mxu1 %v678_v19  ;;  %v35_v53 = vld [vmem:[%s1082_s0] sm:$0xff]  ;;  %v462_v57 = vld [vmem:[%s1085_s3 + $0x10] sm:$0xff]  ;;  %v776_v61 = vpack.c.bf16 %v195_v51, %v193_v49  ;;  %v220_v49 = vld [vmem:[#allocation2 + $0x598] sm:$0xff] }
  0x59   :  { %v820_v2 = vpack.c.bf16 %v463_v58, %v462_v57  ;;  %v484_v19 = vld [vmem:[%s1085_s3 + $0xc0] sm:$0xff] }
  0x5a   :  { %681 = vmatpush1.bf16.msra.mxu1 %v680_v29  ;;  %v830_v28 = vpack.c.bf16 %v485_v20, %v484_v19  ;;  %v468_v29 = vld [vmem:[%s1085_s3 + $0x40] sm:$0xff]  ;;  %v474_v19 = vld [vmem:[%s1085_s3 + $0x70] sm:$0xff]  ;;  %v475_v20 = vld [vmem:[%s1085_s3 + $0x78] sm:$0xff] }
  0x5b   :  { %757 = vmatpush1.bf16.msra.mxu0 %v756_v0  ;;  %683 = vmatprep.subr.bf16.mxu1 %v682_v31  ;;  %v199_v0 = vld [vmem:[#allocation2 + $0x4f0] sm:$0xff]  ;;  %v832_v38 = vpack.c.bf16 %v469_v30, %v468_v29  ;;  %v221_v58 = vld [vmem:[#allocation2 + $0x5a0] sm:$0xff] }
  0x5c   :  { %759 = vmatprep.subr.bf16.mxu0 %v758_v1  ;;  %v202_v1 = vld [vmem:[#allocation2 + $0x508] sm:$0xff]  ;;  %v780_v9 = vpack.c.bf16 %v199_v0, %v197_v63  ;;  %v486_v31 = vld [vmem:[%s1085_s3 + $0xd0] sm:$0xff]  ;;  %v225_v0 = vld [vmem:[#allocation2 + $0x5c0] sm:$0xff] }
  0x5d   :  { %v782_v10 = vpack.c.bf16 %v204_v3, %v202_v1  ;;  %v834_v40 = vpack.c.bf16 %v487_v32, %v486_v31  ;;  %v227_v1 = vld [vmem:[#allocation2 + $0x5d0] sm:$0xff]  ;;  %v232_v3 = vld [vmem:[#allocation2 + $0x5f8] sm:$0xff] }
  0x5e   :  { %685 = vmatpush1.bf16.msra.mxu1 %v684_v41  ;;  %v470_v41 = vld [vmem:[%s1085_s3 + $0x50] sm:$0xff] }
  0x5f   :  { %761 = vmatpush1.bf16.msra.mxu0 %v760_v12  ;;  %815 = vmatprep.subr.bf16.mxu1 %v814_v43  ;;  %v203_v12 = vld [vmem:[#allocation2 + $0x510] sm:$0xff]  ;;  %v836_v47 = vpack.c.bf16 %v471_v42, %v470_v41 }
  0x60   :  { %763 = vmatprep.subr.bf16.mxu0 %v762_v13  ;;  %v206_v13 = vld [vmem:[#allocation2 + $0x528] sm:$0xff]  ;;  %v784_v21 = vpack.c.bf16 %v203_v12, %v201_v11 }
  0x61   :  { %310 = vmatmul.mubr.f32.vlgmr.msra.gmra.mrb[0].mxu1 %v35_v53  ;;  %v786_v22 = vpack.c.bf16 %v208_v15, %v206_v13  ;;  %v219_v53 = vld [vmem:[#allocation2 + $0x590] sm:$0xff]  ;;  %v489_v11 = vld [vmem:[%s1085_s3 + $0xe8] sm:$0xff]  ;;  %v472_v13 = vld [vmem:[%s1085_s3 + $0x60] sm:$0xff] }
  0x62   :  { %817 = vmatpush3.bf16.msra.mxu1 %v816_v54  ;;  %v222_v54 = vld [vmem:[#allocation2 + $0x5a8] sm:$0xff] }
  0x63   :  { %765 = vmatpush1.bf16.msra.mxu0 %v764_v24  ;;  %819 = vmatprep.subr.bf16.mxu1 %v818_v56  ;;  %v207_v24 = vld [vmem:[#allocation2 + $0x530] sm:$0xff]  ;;  %v800_v56 = vpack.c.bf16 %v219_v53, %v217_v52  ;;  %v802_v57 = vpack.c.bf16 %v224_v55, %v222_v54 }
  0x64   :  { %767 = vmatprep.subr.bf16.mxu0 %v766_v25  ;;  %v210_v25 = vld [vmem:[#allocation2 + $0x548] sm:$0xff]  ;;  %v788_v33 = vpack.c.bf16 %v207_v24, %v205_v23  ;;  %v235_v24 = vlaneseq }
  0x65   :  { %v790_v34 = vpack.c.bf16 %v212_v27, %v210_v25  ;;  %v233_v27 = vld [vmem:[%s1084_s2] sm:$0x3]  ;;  %s907_s2 = smov [#allocation5]  }
  0x66   :  { %821 = vmatpush3.bf16.msra.mxu1 %v820_v2  ;;  %v230_v2 = vld [vmem:[#allocation2 + $0x5e8] sm:$0xff]  ;;  %v236_v25 = vshrl.u32 %v235_v24, 7  ;;  %s577_s1 = sshll.u32 %s907_s2, 4  ;;  %s578_s1 = int_to_ptr.vmem [resolvable:$true] %s577_s1 }
  0x67   :  { %769 = vmatpush1.bf16.msra.mxu0 %v768_v36  ;;  %823 = vmatprep.subr.bf16.mxu1 %v822_v4  ;;  %v211_v36 = vld [vmem:[#allocation2 + $0x550] sm:$0xff]  ;;  %v808_v4 = vpack.c.bf16 %v227_v1, %v225_v0  ;;  %v810_v5 = vpack.c.bf16 %v232_v3, %v230_v2  ;;  %s878_s7 = scalar_lea.vmem %s578_s1, 128  ;;  %p883_p9 = scmp.lt.s32.totalorder %s578_s1, %s578_s1 }
  0x68   :  { %771 = vmatprep.subr.bf16.mxu0 %v770_v37  ;;  %v214_v37 = vld [vmem:[#allocation2 + $0x568] sm:$0xff]  ;;  %v792_v43 = vpack.c.bf16 %v211_v36, %v209_v35  ;;  %p879_p8 = scmp.ne.s32.totalorder %s578_s1, %s878_s7  ;;  %p884_p10 = scmp.lt.s32.totalorder %s878_s7, %s878_s7 }
  0x69   :  { %v794_v44 = vpack.c.bf16 %v216_v39, %v214_v37 }
  0x6a   :  { %825 = vmatpush3.bf16.msra.mxu1 %v824_v14  ;;  %v473_v14 = vld [vmem:[%s1085_s3 + $0x68] sm:$0xff]  ;;  %p885_p11 = por %p884_p10, %p883_p9 }
  0x6b   :  { %773 = vmatpush1.bf16.msra.mxu0 %v772_v48  ;;  %827 = vmatprep.subr.bf16.mxu1 %v826_v16  ;;  %v218_v48 = vld [vmem:[#allocation2 + $0x588] sm:$0xff]  ;;  %v840_v15 = vpack.c.bf16 %v473_v14, %v472_v13  ;;  %v490_v16 = vld [vmem:[%s1085_s3 + $0xf0] sm:$0xff] }
  0x6c   :  { %775 = vmatprep.subr.bf16.mxu0 %v774_v50  ;;  %v796_v50 = vpack.c.bf16 %v215_v46, %v213_v45  ;;  %v798_v51 = vpack.c.bf16 %v220_v49, %v218_v48  ;;  %v842_v18 = vpack.c.bf16 %v491_v17, %v490_v16  ;;  %p886_p12 = pnand %p885_p11, %p879_p8 }
  0x6e   :  { %829 = vmatpush3.bf16.msra.mxu1 %v828_v26  ;;  %v237_v26 = vsub.s32 0, %v236_v25 }
  0x6f   :  { %777 = vmatpush1.bf16.msra.mxu0 %v776_v61  ;;  %831 = vmatprep.subr.bf16.mxu1 %v830_v28  ;;  %v228_v61 = vld [vmem:[#allocation2 + $0x5d8] sm:$0xff]  ;;  %v241_v28 = vsub.s32 1, %v236_v25 }
  0x70   :  { %779 = vmatprep.subr.bf16.mxu0 %v778_v62  ;;  %v804_v62 = vpack.c.bf16 %v223_v59, %v221_v58  ;;  %v806_v63 = vpack.c.bf16 %v228_v61, %v226_v60  ;;  %v238_v29 = vrot.slane %v233_v27, %v237_v26 }
  0x71   :  { %v242_v30 = vrot.slane %v233_v27, %v241_v28 }
  0x72   :  { %833 = vmatpush3.bf16.msra.mxu1 %v832_v38 }
  0x73   :  { %781 = vmatpush1.bf16.msra.mxu0 %v780_v9  ;;  %835 = vmatprep.subr.bf16.mxu1 %v834_v40  ;;  %v39_v9 = vld [vmem:[%s1082_s0 + $0x20] sm:$0xff] }
  0x74   :  { %783 = vmatprep.subr.bf16.mxu0 %v782_v10  ;;  %v488_v10 = vld [vmem:[%s1085_s3 + $0xe0] sm:$0xff] }
  0x75   :  { %v838_v12 = vpack.c.bf16 %v489_v11, %v488_v10  ;;  %v586_v40 = vld [vmem:[%s1086_s4] ss:$0 sm:$0xff] }
  0x76   :  { %837 = vmatpush3.bf16.msra.mxu1 %v836_v47 }
  0x77   :  { %785 = vmatpush1.bf16.msra.mxu0 %v784_v21  ;;  %839 = vmatprep.subr.bf16.mxu1 %v838_v12  ;;  %v844_v21 = vpack.c.bf16 %v475_v20, %v474_v19 }
  0x78   :  { %787 = vmatprep.subr.bf16.mxu0 %v786_v22 }
  0x7a   :  { %841 = vmatpush3.bf16.msra.mxu1 %v840_v15 }
  0x7b   :  { %789 = vmatpush1.bf16.msra.mxu0 %v788_v33  ;;  %843 = vmatprep.subr.bf16.mxu1 %v842_v18 }
  0x7c   :  { %791 = vmatprep.subr.bf16.mxu0 %v790_v34 }
  0x7e   :  { %845 = vmatpush3.bf16.msra.mxu1 %v844_v21 }
  0x7f   :  { %793 = vmatpush1.bf16.msra.mxu0 %v792_v43 }
  0x80   :  { %795 = vmatprep.subr.bf16.mxu0 %v794_v44 }
  0x83   :  { %797 = vmatpush1.bf16.msra.mxu0 %v796_v50 }
  0x84   :  { %799 = vmatprep.subr.bf16.mxu0 %v798_v51 }
  0x87   :  { %801 = vmatpush1.bf16.msra.mxu0 %v800_v56 }
  0x88   :  { %803 = vmatprep.subr.bf16.mxu0 %v802_v57 }
  0x8b   :  { %805 = vmatpush1.bf16.msra.mxu0 %v804_v62 }
  0x8c   :  { %807 = vmatprep.subr.bf16.mxu0 %v806_v63 }
  0x8f   :  { %809 = vmatpush1.bf16.msra.mxu0 %v808_v4 }
  0x90   :  { %811 = vmatprep.subr.bf16.mxu0 %v810_v5 }
  0x93   :  { %813 = vmatpush1.bf16.msra.mxu0 %v812_v8 }
  0x96   :  { %452 = vmatmul.mubr.f32.vlgmr.msra.gmra.mrb[0].mxu0 %v39_v9 }
 0x134   :  { %v311_v22 = vpop.f32.mrb[0].mxu1 }
 0x135   :  { %v313_v23 = vpop.f32.mrb[1].mxu1  ;;  %v312_v31 = vadd.f32 %v311_v22, %v238_v29 }
 0x136   :  { %v314_v32 = vadd.f32 %v313_v23, %v242_v30 }
 0x169   :  { %v453_v33 = vpop.f32.mrb[0].mxu0 }
 0x16a   :  { %v847_v34 = vadd.f32 %v453_v33, %v312_v31  ;;  %v455_v35 = vpop.f32.mrb[1].mxu0 }
 0x16b   :  { %v849_v36 = vadd.f32 %v455_v35, %v314_v32 }
 0x16c   :  { %v458_v38 = vmax.f32 %v847_v34, 0.0 }
 0x16d   :  { %v459_v37 = vmax.f32 %v849_v36, 0.0 }
 0x16f   :  { %563 = vmatprep.mubr.f32.mxu1 %v459_v37 }
 0x170   :  { %564 = vmatmul.mubr.f32.vlgmr.msra.gmra.mrb[2].mxu1 %v458_v38 }
 0x243   :  { %v619_v39 = vpop.f32.mrb[2].mxu1 }
 0x244   :  { %v620_v41 = vpop.f32.mrb[3].mxu1 }
 0x245   :  { %v621_v42 = vadd.f32 %v620_v41, %v619_v39 }
 0x247   :  { %v566_v43 = vadd.f32 %v621_v42, %v586_v40 }
 0x249   :  { %570 = vst.msk [vmem:[#allocation5] sm:$0xff] %vm569_vm0, %v566_v43 }
 0x24a   :  { %889 = shalt.err (!%p886_p12)
}
 0x24b   :  { %s890_s10 = scalar_lea.hbm %s1087_s5, 128 }
 0x24c   :  { %p891_p13 = scmp.ne.s32.totalorder %s1087_s5, %s890_s10  ;;  %p894_p0 = scmp.lt.u32.totalorder %s890_s10, %s1087_s5 }
 0x24e   :  { %p896_p1 = pnand %p894_p0, %p891_p13 }
 0x250   :  { %899 = shalt.err (!%p896_p1)
}
 0x251   :  { %580 = dma.vmem_to_hbm [thread:$0]  %s578_s1, 128, %s1087_s5, [#allocation4]  }
 0x252   :  { %902 = dma.done.wait [#allocation4], 128  }
 0x253   :  { %903 = vsyncadd [#allocation4], 4294967168 }
 0x254   :  { %584 = vsyncpa [#allocation3], 1 }
 0x255   :  { %585 = vsyncpa [#allocation4], 1 }

</bundles_post_ra>
